<compile_context>
chip_gen: v7x
topology: tpu7x:2x2x1
jax: 0.10.0
libtpu: 0.0.40
codegen_flags: <defaults>
</compile_context>

<pallas_src>
import functools

import jax
import jax.numpy as jnp
from jax.experimental import pallas as pl
from jax.experimental.pallas import tpu as pltpu


def _round_up(x: int, m: int) -> int:
    return (x + m - 1) // m * m


def _sage_kernel(adj_ref, feat_k_ref, feat_i_ref, w_ref, bias_ref, out_ref,
                 acc_ref, deg_ref):
    k = pl.program_id(1)

    @pl.when(k == 0)
    def _init():
        acc_ref[...] = jnp.zeros_like(acc_ref)
        deg_ref[...] = jnp.zeros_like(deg_ref)

    adj = adj_ref[...]                                        # [TM, TK] bf16
    # f32-accumulated bf16 MXU matmul: partial A @ feat for this k tile.
    acc_ref[...] += jnp.dot(adj, feat_k_ref[...].astype(jnp.bfloat16),
                            preferred_element_type=jnp.float32)
    # In-degree accumulated on the VPU/XLU while the MXU is busy.
    deg_ref[...] += jnp.sum(adj.astype(jnp.float32), axis=1, keepdims=True)

    @pl.when(k == pl.num_programs(1) - 1)
    def _finalize():
        inv_deg = pl.reciprocal(jnp.maximum(deg_ref[...], 1.0), approx=True)
        agg = acc_ref[...] * inv_deg                          # [TM, FP]
        # Fused projection: [feat_i | agg] @ [W_self; W_neigh]
        h = jnp.concatenate([feat_i_ref[...], agg], axis=-1)  # [TM, 2*FP]
        out = jnp.dot(h, w_ref[...], preferred_element_type=jnp.float32)
        out = out + bias_ref[...]
        out_ref[...] = jnp.maximum(out, 0.0)                  # relu_()


@functools.partial(jax.jit, static_argnames=("tm", "tk"))
def sage_forward(adj, feat, w_self, w_neigh, bias, *, tm=128, tk=128):
    """adj: [N, N] (A[i, j]=1 iff edge j->i), feat: [N, F_in] f32,
    w_self / w_neigh: [F_in, F_out] f32, bias: [F_out] f32 -> [N, F_out] f32."""
    n, f_in = feat.shape
    f_out = w_self.shape[1]

    # Lane-dense padded sizes.
    fp = _round_up(f_in, 128)
    fop = _round_up(f_out, 128)
    n_pad = _round_up(_round_up(n, tm), tk)

    # Pad + cast inputs (zero padding is exact for both the aggregation and
    # the projections).
    adj_p = jnp.zeros((n_pad, n_pad), jnp.bfloat16)
    adj_p = adj_p.at[:n, :n].set(adj.astype(jnp.bfloat16))
    feat_p = jnp.zeros((n_pad, fp), jnp.float32).at[:n, :f_in].set(feat)
    w_stack = jnp.zeros((2 * fp, fop), jnp.float32)
    w_stack = w_stack.at[:f_in, :f_out].set(w_self)
    w_stack = w_stack.at[fp:fp + f_in, :f_out].set(w_neigh)
    bias2d = jnp.zeros((1, fop), jnp.float32).at[0, :f_out].set(bias)

    grid = (n_pad // tm, n_pad // tk)

    grid_spec = pltpu.PrefetchScalarGridSpec(
        num_scalar_prefetch=0,
        grid=grid,
        in_specs=[
            pl.BlockSpec((tm, tk), lambda i, k: (i, k)),       # adj tile
            pl.BlockSpec((tk, fp), lambda i, k: (k, 0)),       # feat (reduce)
            pl.BlockSpec((tm, fp), lambda i, k: (i, 0)),       # feat (self)
            pl.BlockSpec((2 * fp, fop), lambda i, k: (0, 0)),  # stacked W
            pl.BlockSpec((1, fop), lambda i, k: (0, 0)),       # bias
        ],
        out_specs=pl.BlockSpec((tm, fop), lambda i, k: (i, 0)),
        scratch_shapes=[
            pltpu.VMEM((tm, fp), jnp.float32),   # A @ feat accumulator
            pltpu.VMEM((tm, 1), jnp.float32),    # in-degree accumulator
        ],
    )

    cost = pl.CostEstimate(
        flops=2 * n_pad * n_pad * fp + 2 * n_pad * (2 * fp) * fop,
        transcendentals=0,
        bytes_accessed=(adj_p.size * 2 + 2 * feat_p.size * 4
                        + w_stack.size * 4 + n_pad * fop * 4),
    )

    out_p = pl.pallas_call(
        _sage_kernel,
        out_shape=jax.ShapeDtypeStruct((n_pad, fop), jnp.float32),
        grid_spec=grid_spec,
        compiler_params=pltpu.CompilerParams(
            dimension_semantics=("parallel", "arbitrary"),
            vmem_limit_bytes=32 * 1024 * 1024),
        cost_estimate=cost,
    )(adj_p, feat_p, feat_p, w_stack, bias2d)

    return out_p[:n, :f_out]


def reference_forward(adj, feat, w_self, w_neigh, bias):
    deg = jnp.maximum(jnp.sum(adj, axis=1, keepdims=True), 1.0)
    agg = (adj @ feat) / deg
    out = feat @ w_self + agg @ w_neigh + bias[None, :]
    return jnp.maximum(out, 0.0)


if __name__ == "__main__":
    key = jax.random.PRNGKey(0)
    k_feat, k_adj, k_ws, k_wn, k_b = jax.random.split(key, 5)

    num_nodes = 200          # non-multiple of 128: exercises padding + grid
    in_feats = 48
    out_feats = 32

    # Deterministic synthetic graph: random sparse adjacency (edge j -> i).
    adj = (jax.random.uniform(k_adj, (num_nodes, num_nodes)) < 0.25)
    adj = adj.astype(jnp.float32)

    feat = jax.random.normal(k_feat, (num_nodes, in_feats), dtype=jnp.float32)

    # Deterministic parameter init (Xavier-ish scaling), shapes from SAGEConv.
    scale = 1.0 / jnp.sqrt(jnp.float32(in_feats))
    w_self = jax.random.normal(k_ws, (in_feats, out_feats), jnp.float32) * scale
    w_neigh = jax.random.normal(k_wn, (in_feats, out_feats), jnp.float32) * scale
    bias = jax.random.normal(k_b, (out_feats,), jnp.float32) * 0.01

    out = sage_forward(adj, feat, w_self, w_neigh, bias)
    out = jax.block_until_ready(out)

    ref = reference_forward(adj, feat, w_self, w_neigh, bias)
    assert out.shape == (num_nodes, out_feats)
    # bf16 adjacency matmul (f32 accumulation) vs pure-f32 reference.
    assert jnp.allclose(out, ref, atol=2e-2, rtol=2e-2), float(
        jnp.max(jnp.abs(out - ref)))

    print("KERNEL_OK")
</pallas_src>

<mosaic_0001>
module attributes {stable_mosaic.version = 11 : i64} {
  func.func @_sage_kernel(%arg0: i32, %arg1: i32, %arg2: memref<128x128xbf16, #tpu.memory_space<vmem>>, %arg3: memref<128x128xf32, #tpu.memory_space<vmem>>, %arg4: memref<128x128xf32, #tpu.memory_space<vmem>>, %arg5: memref<256x128xf32, #tpu.memory_space<vmem>>, %arg6: memref<1x128xf32, #tpu.memory_space<vmem>>, %arg7: memref<128x128xf32, #tpu.memory_space<vmem>>, %arg8: memref<128x128xf32, #tpu.memory_space<vmem>>, %arg9: memref<128x1xf32, #tpu.memory_space<vmem>>) attributes {dimension_semantics = [#tpu.dimension_semantics<parallel>, #tpu.dimension_semantics<arbitrary>], iteration_bounds = array<i64: 2, 2>, scalar_prefetch = 0 : i64, scratch_operands = 2 : i64, tpu.core_type = #tpu.core_type<tc>, window_params = [{transform_indices = @transform_0, window_bounds = array<i64: 128, 128>}, {transform_indices = @transform_1, window_bounds = array<i64: 128, 128>}, {transform_indices = @transform_2, window_bounds = array<i64: 128, 128>}, {pipeline_mode = #tpu.pipeline_mode<synchronous>, transform_indices = @transform_3, window_bounds = array<i64: 256, 128>}, {pipeline_mode = #tpu.pipeline_mode<synchronous>, transform_indices = @transform_4, window_bounds = array<i64: 1, 128>}, {transform_indices = @transform_5, window_bounds = array<i64: 128, 128>}]} {
    %c0_i32 = arith.constant 0 : i32
    %0 = arith.cmpi eq, %arg1, %c0_i32 : i32
    %1 = arith.extui %0 : i1 to i32
    %c0_i32_0 = arith.constant 0 : i32
    %2 = arith.cmpi ne, %1, %c0_i32_0 : i32
    scf.if %2 {
      %cst_14 = arith.constant 0.000000e+00 : f32
      %19 = vector.broadcast %cst_14 : f32 to vector<128x128xf32>
      %c0_15 = arith.constant 0 : index
      %c0_16 = arith.constant 0 : index
      %20 = vector.load %arg8[%c0_15, %c0_16] : memref<128x128xf32, #tpu.memory_space<vmem>>, vector<128x128xf32>
      tpu.vector_store %arg8[%c0_15, %c0_16], %19 {strides = array<i32>} : memref<128x128xf32, #tpu.memory_space<vmem>>, vector<128x128xf32>,
      %cst_17 = arith.constant 0.000000e+00 : f32
      %21 = vector.broadcast %cst_17 : f32 to vector<128x1xf32>
      %c0_18 = arith.constant 0 : index
      %c0_19 = arith.constant 0 : index
      %22 = vector.load %arg9[%c0_18, %c0_19] : memref<128x1xf32, #tpu.memory_space<vmem>>, vector<128x1xf32>
      tpu.vector_store %arg9[%c0_18, %c0_19], %21 {strides = array<i32>} : memref<128x1xf32, #tpu.memory_space<vmem>>, vector<128x1xf32>,
    } else {
    }
    %c0 = arith.constant 0 : index
    %c0_1 = arith.constant 0 : index
    %3 = vector.load %arg2[%c0, %c0_1] : memref<128x128xbf16, #tpu.memory_space<vmem>>, vector<128x128xbf16>
    %c0_2 = arith.constant 0 : index
    %c0_3 = arith.constant 0 : index
    %4 = vector.load %arg8[%c0_2, %c0_3] : memref<128x128xf32, #tpu.memory_space<vmem>>, vector<128x128xf32>
    %c0_4 = arith.constant 0 : index
    %c0_5 = arith.constant 0 : index
    %5 = vector.load %arg3[%c0_4, %c0_5] : memref<128x128xf32, #tpu.memory_space<vmem>>, vector<128x128xf32>
    %6 = arith.truncf %5 : vector<128x128xf32> to vector<128x128xbf16>
    %cst = arith.constant dense<0.000000e+00> : vector<128x128xf32>
    %7 = tpu.matmul %3, %6, %cst {dimension_numbers = #tpu.dot_dimension_numbers<[1], [0], [0], [1], [0, 0, 1, 1], [], []>} : vector<128x128xbf16>, vector<128x128xbf16>, vector<128x128xf32> -> vector<128x128xf32>
    %8 = arith.addf %4, %7 : vector<128x128xf32>
    %c0_6 = arith.constant 0 : index
    %c0_7 = arith.constant 0 : index
    %9 = vector.load %arg8[%c0_6, %c0_7] : memref<128x128xf32, #tpu.memory_space<vmem>>, vector<128x128xf32>
    tpu.vector_store %arg8[%c0_6, %c0_7], %8 {strides = array<i32>} : memref<128x128xf32, #tpu.memory_space<vmem>>, vector<128x128xf32>,
    %c0_8 = arith.constant 0 : index
    %c0_9 = arith.constant 0 : index
    %10 = vector.load %arg9[%c0_8, %c0_9] : memref<128x1xf32, #tpu.memory_space<vmem>>, vector<128x1xf32>
    %11 = arith.extf %3 : vector<128x128xbf16> to vector<128x128xf32>
    %cst_10 = arith.constant dense<0.000000e+00> : vector<128xf32>
    %12 = vector.multi_reduction <add>, %11, %cst_10 [1] : vector<128x128xf32> to vector<128xf32>
    %13 = vector.shape_cast %12 : vector<128xf32> to vector<128x1xf32>
    %14 = arith.addf %10, %13 : vector<128x1xf32>
    %c0_11 = arith.constant 0 : index
    %c0_12 = arith.constant 0 : index
    %15 = vector.load %arg9[%c0_11, %c0_12] : memref<128x1xf32, #tpu.memory_space<vmem>>, vector<128x1xf32>
    tpu.vector_store %arg9[%c0_11, %c0_12], %14 {strides = array<i32>} : memref<128x1xf32, #tpu.memory_space<vmem>>, vector<128x1xf32>,
    %c1_i32 = arith.constant 1 : i32
    %16 = arith.cmpi eq, %arg1, %c1_i32 : i32
    %17 = arith.extui %16 : i1 to i32
    %c0_i32_13 = arith.constant 0 : i32
    %18 = arith.cmpi ne, %17, %c0_i32_13 : i32
    scf.if %18 {
      %c0_14 = arith.constant 0 : index
      %c0_15 = arith.constant 0 : index
      %19 = vector.load %arg9[%c0_14, %c0_15] : memref<128x1xf32, #tpu.memory_space<vmem>>, vector<128x1xf32>
      %cst_16 = arith.constant 1.000000e+00 : f32
      %20 = vector.broadcast %cst_16 : f32 to vector<128x1xf32>
      %21 = arith.maximumf %19, %20 : vector<128x1xf32>
      %22 = tpu.reciprocal %21 {approx = true} : vector<128x1xf32> -> vector<128x1xf32>
      %c0_17 = arith.constant 0 : index
      %c0_18 = arith.constant 0 : index
      %23 = vector.load %arg8[%c0_17, %c0_18] : memref<128x128xf32, #tpu.memory_space<vmem>>, vector<128x128xf32>
      %24 = vector.broadcast %22 : vector<128x1xf32> to vector<128x128xf32>
      %25 = arith.mulf %23, %24 : vector<128x128xf32>
      %c0_19 = arith.constant 0 : index
      %c0_20 = arith.constant 0 : index
      %26 = vector.load %arg4[%c0_19, %c0_20] : memref<128x128xf32, #tpu.memory_space<vmem>>, vector<128x128xf32>
      %27 = tpu.concatenate %26, %25 in 1 : vector<128x128xf32>, vector<128x128xf32> -> vector<128x256xf32>
      %c0_21 = arith.constant 0 : index
      %c0_22 = arith.constant 0 : index
      %28 = vector.load %arg5[%c0_21, %c0_22] : memref<256x128xf32, #tpu.memory_space<vmem>>, vector<256x128xf32>
      %cst_23 = arith.constant dense<0.000000e+00> : vector<128x128xf32>
      %29 = tpu.matmul %27, %28, %cst_23 {dimension_numbers = #tpu.dot_dimension_numbers<[1], [0], [0], [1], [0, 0, 1, 1], [], []>} : vector<128x256xf32>, vector<256x128xf32>, vector<128x128xf32> -> vector<128x128xf32>
      %c0_24 = arith.constant 0 : index
      %c0_25 = arith.constant 0 : index
      %30 = vector.load %arg6[%c0_24, %c0_25] : memref<1x128xf32, #tpu.memory_space<vmem>>, vector<1x128xf32>
      %31 = vector.broadcast %30 : vector<1x128xf32> to vector<128x128xf32>
      %32 = arith.addf %29, %31 : vector<128x128xf32>
      %cst_26 = arith.constant 0.000000e+00 : f32
      %33 = vector.broadcast %cst_26 : f32 to vector<128x128xf32>
      %34 = arith.maximumf %32, %33 : vector<128x128xf32>
      %c0_27 = arith.constant 0 : index
      %c0_28 = arith.constant 0 : index
      %35 = vector.load %arg7[%c0_27, %c0_28] : memref<128x128xf32, #tpu.memory_space<vmem>>, vector<128x128xf32>
      tpu.vector_store %arg7[%c0_27, %c0_28], %34 {strides = array<i32>} : memref<128x128xf32, #tpu.memory_space<vmem>>, vector<128x128xf32>,
    } else {
    }
    return
  }
  func.func @transform_0(%arg0: i32, %arg1: i32) -> (i32, i32) {
    %c0_i32 = arith.constant 0 : i32
    return %arg0, %arg1 : i32, i32
  }
  func.func @transform_1(%arg0: i32, %arg1: i32) -> (i32, i32) {
    %c0_i32 = arith.constant 0 : i32
    %c0_i32_0 = arith.constant 0 : i32
    return %arg1, %c0_i32 : i32, i32
  }
  func.func @transform_2(%arg0: i32, %arg1: i32) -> (i32, i32) {
    %c0_i32 = arith.constant 0 : i32
    %c0_i32_0 = arith.constant 0 : i32
    return %arg0, %c0_i32 : i32, i32
  }
  func.func @transform_3(%arg0: i32, %arg1: i32) -> (i32, i32) {
    %c0_i32 = arith.constant 0 : i32
    %c0_i32_0 = arith.constant 0 : i32
    %c0_i32_1 = arith.constant 0 : i32
    return %c0_i32, %c0_i32_0 : i32, i32
  }
  func.func @transform_4(%arg0: i32, %arg1: i32) -> (i32, i32) {
    %c0_i32 = arith.constant 0 : i32
    %c0_i32_0 = arith.constant 0 : i32
    %c0_i32_1 = arith.constant 0 : i32
    return %c0_i32, %c0_i32_0 : i32, i32
  }
  func.func @transform_5(%arg0: i32, %arg1: i32) -> (i32, i32) {
    %c0_i32 = arith.constant 0 : i32
    %c0_i32_0 = arith.constant 0 : i32
    return %arg0, %c0_i32 : i32, i32
  }
}

</mosaic_0001>

<bundles_post_ra>
// kernel: sage_forward.1
= control target key start
LH: loop header
LB: loop body
LE: loop exit
PB: predicated region body
PF: predicated region fallthrough
CT: control target
= control target key end

     0   :  { %s1671_s18 = smov 0   ;;  %s1673_s19 = smov 0   ;;  %s2004_s0 = inlined_call_operand.vmem [shape: bf16[256,256], index: 0, kind: input, shape index: {}]   ;;  %s2005_s1 = inlined_call_operand.vmem [shape: f32[256,128], index: 1, kind: input, shape index: {}, may-alias: {1,2}]   ;;  %s2006_s2 = inlined_call_operand.vmem [shape: f32[256,128], index: 2, kind: input, shape index: {}, may-alias: {1,2}]   ;;  %s2007_s3 = inlined_call_operand.vmem [shape: f32[256,128], index: 3, kind: input, shape index: {}]   ;;  %s2008_s4 = inlined_call_operand.vmem [shape: f32[1,128], index: 4, kind: input, shape index: {}]   ;;  %s2009_s5 = inlined_call_operand.vmem [shape: f32[256,128], index: 5, kind: output, shape index: {}]  }
   0x1   :  { %s1675_s20 = smov 0   ;;  %s1677_s21 = smov 0  }
   0x2   :  { %s1679_s22 = smov 0   ;;  %s1681_s23 = smov 0  }
   0x3   :  { %s1683_s24 = smov 0  }
   0x4 LB: > { %s24_s25 = sadd.s32 1, %s1629_s22  ;;  %s27_s26 = sadd.s32 1, %s1633_s23  ;;  %s1637_s24 = sphi %s1683_s24, %s15_s24   ;;  %s1633_s23 = sphi %s1681_s23, %s2015_s23   ;;  %s1629_s22 = sphi %s1679_s22, %s2014_s22   ;;  %s1625_s21 = sphi %s1677_s21, %s2013_s21   ;;  %s1621_s20 = sphi %s1675_s20, %s2012_s20   ;;  %s1617_s19 = sphi %s1673_s19, %s2011_s19   ;;  %s1613_s18 = sphi %s1671_s18, %s2010_s18  }
   0x5   : > { %p25_p0 = scmp.ge.s32.totalorder %s24_s25, 2  ;;  %p43_p1 = scmp.ne.s32.totalorder %s1617_s19, %s1613_s18 }
   0x6   : > { %p44_p2 = scmp.eq.s32.totalorder %s1637_s24, 0  ;;  %s36_s30 = sadd.s32 1, %s1617_s19 }
   0x7   : > { %s2017_s25 = smov (%p25_p0, %s24_s25), 0  ;;  %s2019_s26 = smov (!%p25_p0, %s27_s26), %s1633_s23 }
   0x8   : > { %p45_p3 = por %p44_p2, %p43_p1  ;;  %p29_p4 = scmp.ge.s32.totalorder %s2019_s26, 2 }
   0x9   : > { %s32_s27 = ssub.s32 %s1629_s22, %s2017_s25  ;;  %p1256_p6 = scmp.ge.s32.totalorder %s1637_s24, 4 }
   0xa   : > { %s2021_s26 = smov (%p29_p4, %s2019_s26), 0 }
   0xb   : > { %s31_s28 = ssub.s32 %s1633_s23, %s2021_s26  ;;  %195 = sbr.rel (%p1256_p6) target bundleno = 34 (0x22), region = 24 }
   0xc   : > { %s33_s29 = sor.u32 %s32_s27, %s31_s28 }
   0xd   : > { %p34_p5 = scmp.eq.s32.totalorder %s33_s29, 0 }
   0xf   : > { %s1722_s6 = scalar_select %p34_p5, %s1617_s19, %s36_s30  }
  0x12   : > { %198 = sbr.rel (!%p45_p3) target bundleno = 34 (0x22), region = 28  ;;  %s200_s7 = sand.u32 (%p45_p3), 1, %s1617_s19  }
  0x13   : > { %s1282_s8 = sshll.u32 (%p45_p3), %s1633_s23, 5  ;;  %s1257_s9 = sshll.u32 (%p45_p3), %s200_s7, 6 }
  0x14   : > { %s205_s10 = sadd.s32 (%p45_p3), %s1629_s22, %s1282_s8  ;;  %s202_s15 = scalar_lea.vmem (%p45_p3), [#allocation4], %s1257_s9 }
  0x15   : > { %s1260_s11 = sshll.u32 (%p45_p3), %s205_s10, 2 }
  0x16   : > { %s1731_s14 = scalar_lea.vmem (%p45_p3), %s2004_s0, %s1260_s11 }
  0x17   : > { %v223_v0 = vld [vmem:[%s1731_s14] sm:$0xf] (%p45_p3)  ;;  %v225_v1 = vld [vmem:[%s1731_s14 + $0x8] sm:$0xf] (%p45_p3)  ;;  %v227_v2 = vld [vmem:[%s1731_s14 + $0x10] sm:$0xf] (%p45_p3) }
  0x18   : > { %224 = vst [vmem:[%s202_s15] sm:$0xf] (%p45_p3), %v223_v0  ;;  %226 = vst [vmem:[%s202_s15 + $0x4] sm:$0xf] (%p45_p3), %v225_v1  ;;  %v229_v3 = vld [vmem:[%s1731_s14 + $0x18] sm:$0xf] (%p45_p3) }
  0x19   : > { %228 = vst [vmem:[%s202_s15 + $0x8] sm:$0xf] %v227_v2  ;;  %v231_v4 = vld [vmem:[%s1731_s14 + $0x20] sm:$0xf]  ;;  %v233_v5 = vld [vmem:[%s1731_s14 + $0x28] sm:$0xf] }
  0x1a   : > { %230 = vst [vmem:[%s202_s15 + $0xc] sm:$0xf] %v229_v3  ;;  %232 = vst [vmem:[%s202_s15 + $0x10] sm:$0xf] %v231_v4  ;;  %v235_v6 = vld [vmem:[%s1731_s14 + $0x30] sm:$0xf] }
  0x1b   : > { %234 = vst [vmem:[%s202_s15 + $0x14] sm:$0xf] %v233_v5  ;;  %v237_v7 = vld [vmem:[%s1731_s14 + $0x38] sm:$0xf]  ;;  %v239_v8 = vld [vmem:[%s1731_s14 + $0x40] sm:$0xf] }
  0x1c   : > { %236 = vst [vmem:[%s202_s15 + $0x18] sm:$0xf] %v235_v6  ;;  %238 = vst [vmem:[%s202_s15 + $0x1c] sm:$0xf] %v237_v7  ;;  %v241_v9 = vld [vmem:[%s1731_s14 + $0x48] sm:$0xf] }
  0x1d   : > { %240 = vst [vmem:[%s202_s15 + $0x20] sm:$0xf] %v239_v8  ;;  %v243_v10 = vld [vmem:[%s1731_s14 + $0x50] sm:$0xf]  ;;  %v245_v11 = vld [vmem:[%s1731_s14 + $0x58] sm:$0xf] }
  0x1e   : > { %242 = vst [vmem:[%s202_s15 + $0x24] sm:$0xf] %v241_v9  ;;  %244 = vst [vmem:[%s202_s15 + $0x28] sm:$0xf] %v243_v10  ;;  %v247_v12 = vld [vmem:[%s1731_s14 + $0x60] sm:$0xf] }
  0x1f   : > { %246 = vst [vmem:[%s202_s15 + $0x2c] sm:$0xf] %v245_v11  ;;  %v249_v13 = vld [vmem:[%s1731_s14 + $0x68] sm:$0xf]  ;;  %v251_v14 = vld [vmem:[%s1731_s14 + $0x70] sm:$0xf] }
  0x20   : > { %248 = vst [vmem:[%s202_s15 + $0x30] sm:$0xf] %v247_v12  ;;  %250 = vst [vmem:[%s202_s15 + $0x34] sm:$0xf] %v249_v13  ;;  %v253_v15 = vld [vmem:[%s1731_s14 + $0x78] sm:$0xf] }
  0x21   : > { %252 = vst [vmem:[%s202_s15 + $0x38] sm:$0xf] %v251_v14  ;;  %254 = vst [vmem:[%s202_s15 + $0x3c] sm:$0xf] %v253_v15 }
  0x22 PF: > { %p1261_p7 = scmp.ge.s32.totalorder %s1637_s24, 1  ;;  %p326_p8 = scmp.lt.s32.totalorder %s1637_s24, 5 }
  0x24   : > { %p327_p9 = pnand %p1261_p7, %p326_p8 }
  0x25   : > { %s333_s16 = sand.u32 (!%p327_p9), 1, %s1613_s18   ;;  %s1263_s17 = sshll.u32 (!%p327_p9), %s1621_s20, 4 }
  0x26   : > { %330 = sbr.rel (%p327_p9) target bundleno = 705 (0x2c1), region = 77  ;;  %s1262_s27 = sshll.u32 (!%p327_p9), %s333_s16, 6 }
  0x27   : > { %p372_p10 = scmp.lt.s32.totalorder (!%p327_p9), %s1263_s17, 31  ;;  %s1265_s28 = sshll.u32 (!%p327_p9), %s1625_s21, 4 }
  0x28   : > { %p378_p11 = scmp.lt.s32.totalorder (!%p327_p9), %s1265_s28, 31  ;;  %s1769_s21 = scalar_lea.vmem (!%p327_p9), [#allocation4], %s1262_s27 }
  0x29   : > { %p1269_p12 = scmp.ne.s32.totalorder (!%p327_p9), %s1621_s20, 0 }
  0x2d   : > { %s2023_s17 = smov (!%p372_p10, %s1263_s17), 31  ;;  %s2025_s28 = smov (!%p378_p11, %s1265_s28), 31 }
  0x2e   : > { %s1264_s29 = sshll.u32 %s2023_s17, 3  ;;  %s1266_s9 = sshll.u32 %s2025_s28, 3  ;;  %vm410_vm0 = vcmask (!%p1269_p12), 7168   ;;  %v1639_v16 = vmov (!%p1269_p12), 0.0  }
  0x2f   : > { %s1757_s8 = scalar_lea.vmem %s2005_s1, %s1264_s29  ;;  %s1762_s12 = scalar_lea.vmem %s2006_s2, %s1266_s9  ;;  %394 = vst [vmem:[#allocation2] sm:$0xff] (!%p1269_p12), %v1639_v16  ;;  %395 = vst [vmem:[#allocation2 + $0x8] sm:$0xff] (!%p1269_p12), %v1639_v16 }
  0x30   : > { %s1767_s14 = scalar_lea.vmem %s2009_s5, %s1266_s9  ;;  %393 = sbr.rel (%p1269_p12) target bundleno = 63 (0x3f), region = 85  ;;  %396 = vst [vmem:[#allocation2 + $0x10] sm:$0xff] (!%p1269_p12), %v1639_v16  ;;  %397 = vst [vmem:[#allocation2 + $0x18] sm:$0xff] (!%p1269_p12), %v1639_v16 }
  0x31   : > { %398 = vst [vmem:[#allocation2 + $0x20] sm:$0xff] (!%p1269_p12), %v1639_v16  ;;  %399 = vst [vmem:[#allocation2 + $0x28] sm:$0xff] (!%p1269_p12), %v1639_v16 }
  0x32   : > { %400 = vst [vmem:[#allocation2 + $0x30] sm:$0xff] (!%p1269_p12), %v1639_v16  ;;  %401 = vst [vmem:[#allocation2 + $0x38] sm:$0xff] (!%p1269_p12), %v1639_v16 }
  0x33   : > { %402 = vst [vmem:[#allocation2 + $0x40] sm:$0xff] (!%p1269_p12), %v1639_v16  ;;  %403 = vst [vmem:[#allocation2 + $0x48] sm:$0xff] (!%p1269_p12), %v1639_v16 }
  0x34   : > { %404 = vst [vmem:[#allocation2 + $0x50] sm:$0xff] (!%p1269_p12), %v1639_v16  ;;  %405 = vst [vmem:[#allocation2 + $0x58] sm:$0xff] (!%p1269_p12), %v1639_v16 }
  0x35   : > { %406 = vst [vmem:[#allocation2 + $0x60] sm:$0xff] (!%p1269_p12), %v1639_v16  ;;  %407 = vst [vmem:[#allocation2 + $0x68] sm:$0xff] (!%p1269_p12), %v1639_v16 }
  0x36   : > { %408 = vst [vmem:[#allocation2 + $0x70] sm:$0xff] (!%p1269_p12), %v1639_v16  ;;  %409 = vst [vmem:[#allocation2 + $0x78] sm:$0xff] (!%p1269_p12), %v1639_v16 }
  0x37   : > { %411 = vst.msk [vmem:[#allocation3] sm:$0xff] %vm410_vm0, %v1639_v16  ;;  %412 = vst.msk [vmem:[#allocation3 + $0x8] sm:$0xff] %vm410_vm0, %v1639_v16 }
  0x38   : > { %413 = vst.msk [vmem:[#allocation3 + $0x10] sm:$0xff] %vm410_vm0, %v1639_v16  ;;  %414 = vst.msk [vmem:[#allocation3 + $0x18] sm:$0xff] %vm410_vm0, %v1639_v16 }
  0x39   : > { %415 = vst.msk [vmem:[#allocation3 + $0x20] sm:$0xff] %vm410_vm0, %v1639_v16  ;;  %416 = vst.msk [vmem:[#allocation3 + $0x28] sm:$0xff] %vm410_vm0, %v1639_v16 }
  0x3a   : > { %417 = vst.msk [vmem:[#allocation3 + $0x30] sm:$0xff] %vm410_vm0, %v1639_v16  ;;  %418 = vst.msk [vmem:[#allocation3 + $0x38] sm:$0xff] %vm410_vm0, %v1639_v16 }
  0x3b   : > { %419 = vst.msk [vmem:[#allocation3 + $0x40] sm:$0xff] %vm410_vm0, %v1639_v16  ;;  %420 = vst.msk [vmem:[#allocation3 + $0x48] sm:$0xff] %vm410_vm0, %v1639_v16 }
  0x3c   : > { %421 = vst.msk [vmem:[#allocation3 + $0x50] sm:$0xff] %vm410_vm0, %v1639_v16  ;;  %422 = vst.msk [vmem:[#allocation3 + $0x58] sm:$0xff] %vm410_vm0, %v1639_v16 }
  0x3d   : > { %423 = vst.msk [vmem:[#allocation3 + $0x60] sm:$0xff] %vm410_vm0, %v1639_v16  ;;  %424 = vst.msk [vmem:[#allocation3 + $0x68] sm:$0xff] %vm410_vm0, %v1639_v16 }
  0x3e   : > { %425 = vst.msk [vmem:[#allocation3 + $0x70] sm:$0xff] %vm410_vm0, %v1639_v16  ;;  %426 = vst.msk [vmem:[#allocation3 + $0x78] sm:$0xff] %vm410_vm0, %v1639_v16 }
  0x3f PF: > { %v459_v17 = vld [vmem:[%s1757_s8] sm:$0xff]  ;;  %v460_v18 = vld [vmem:[%s1757_s8 + $0x8] sm:$0xff]  ;;  %v461_v19 = vld [vmem:[%s1757_s8 + $0x10] sm:$0xff]  ;;  %vm740_vm1 = vcmask 7168   ;;  %p1278_p13 = scmp.ne.s32.totalorder %s1621_s20, 1 }
  0x40   : > { %v475_v20 = vpack.c.bf16 %v460_v18, %v459_v17  ;;  %v462_v21 = vld [vmem:[%s1757_s8 + $0x18] sm:$0xff]  ;;  %v463_v23 = vld [vmem:[%s1757_s8 + $0x20] sm:$0xff]  ;;  %v464_v24 = vld [vmem:[%s1757_s8 + $0x28] sm:$0xff] }
  0x41   : > { %v476_v22 = vpack.c.bf16 %v462_v21, %v461_v19  ;;  %v477_v25 = vpack.c.bf16 %v464_v24, %v463_v23  ;;  %v427_v26 = vld [vmem:[%s1769_s21] sm:$0xff]   ;;  %v465_v28 = vld [vmem:[%s1757_s8 + $0x30] sm:$0xff]  ;;  %v466_v29 = vld [vmem:[%s1757_s8 + $0x38] sm:$0xff] }
  0x42   : > { %1379 = vmatprep.subr.bf16.mxu0 %v475_v20  ;;  %1443 = vmatprep.subr.bf16.mxu1 %v475_v20  ;;  %v435_v27 = vld [vmem:[%s1769_s21 + $0x20] sm:$0xff]   ;;  %v1799_v30 = vld [vmem:[%s1769_s21 + $0x8] sm:$0xff]   ;;  %v676_v32 = vunpack.c.l.bf16 %v427_v26  ;;  %v478_v33 = vpack.c.bf16 %v466_v29, %v465_v28  ;;  %v677_v37 = vunpack.c.h.bf16 %v427_v26  ;;  %v469_v39 = vld [vmem:[%s1757_s8 + $0x50] sm:$0xff] }
  0x43   : > { %1380 = vmatpush3.bf16.msra.mxu0 %v475_v20  ;;  %1451 = vmatpush3.bf16.msra.mxu1 %v475_v20  ;;  %v678_v31 = vunpack.c.l.bf16 %v1799_v30  ;;  %v467_v34 = vld [vmem:[%s1757_s8 + $0x40] sm:$0xff]  ;;  %v468_v35 = vld [vmem:[%s1757_s8 + $0x48] sm:$0xff]  ;;  %v679_v36 = vunpack.c.h.bf16 %v1799_v30  ;;  %v470_v40 = vld [vmem:[%s1757_s8 + $0x58] sm:$0xff]  ;;  %v685_v53 = vunpack.c.h.bf16 %v435_v27  ;;  %v684_v54 = vunpack.c.l.bf16 %v435_v27 }
  0x44   : > { %1381 = vmatprep.subr.bf16.mxu0 %v476_v22  ;;  %1444 = vmatprep.subr.bf16.mxu1 %v476_v22  ;;  %v479_v38 = vpack.c.bf16 %v468_v35, %v467_v34  ;;  %v431_v41 = vld [vmem:[%s1769_s21 + $0x10] sm:$0xff]   ;;  %v480_v44 = vpack.c.bf16 %v470_v40, %v469_v39  ;;  %v471_v45 = vld [vmem:[%s1757_s8 + $0x60] sm:$0xff]  ;;  %v472_v46 = vld [vmem:[%s1757_s8 + $0x68] sm:$0xff] }
  0x45   : > { %1395 = vmatprep.mubr.bf16.mxu0 %v427_v26  ;;  %1403 = vmatprep.mubr.bf16.mxu1 %v435_v27  ;;  %v681_v42 = vunpack.c.h.bf16 %v431_v41  ;;  %v680_v43 = vunpack.c.l.bf16 %v431_v41  ;;  %v433_v47 = vld [vmem:[%s1769_s21 + $0x18] sm:$0xff]   ;;  %v481_v50 = vpack.c.bf16 %v472_v46, %v471_v45  ;;  %v473_v51 = vld [vmem:[%s1757_s8 + $0x70] sm:$0xff]  ;;  %v437_v56 = vld [vmem:[%s1769_s21 + $0x28] sm:$0xff]  }
  0x46   : > { %696 = vadd.xlane.f32.xlu1 %v678_v31  ;;  %692 = vadd.xlane.f32.xlu0 %v676_v32  ;;  %v683_v48 = vunpack.c.h.bf16 %v433_v47  ;;  %v682_v49 = vunpack.c.l.bf16 %v433_v47  ;;  %v474_v52 = vld [vmem:[%s1757_s8 + $0x78] sm:$0xff]  ;;  %v687_v57 = vunpack.c.h.bf16 %v437_v56  ;;  %v686_v58 = vunpack.c.l.bf16 %v437_v56  ;;  %v439_v59 = vld [vmem:[%s1769_s21 + $0x30] sm:$0xff]   ;;  %v660_v2 = vld [vmem:[#allocation3] sm:$0xff] }
  0x47   : > { %1382 = vmatpush3.bf16.msra.mxu0 %v476_v22  ;;  %1452 = vmatpush3.bf16.msra.mxu1 %v476_v22  ;;  %v482_v55 = vpack.c.bf16 %v474_v52, %v473_v51  ;;  %v689_v60 = vunpack.c.h.bf16 %v439_v59  ;;  %v688_v61 = vunpack.c.l.bf16 %v439_v59  ;;  %v441_v62 = vld [vmem:[%s1769_s21 + $0x38] sm:$0xff]   ;;  %v662_v1 = vld [vmem:[#allocation3 + $0x10] sm:$0xff]  ;;  %v661_v8 = vld [vmem:[#allocation3 + $0x8] sm:$0xff] }
  0x48   : > { %1383 = vmatprep.subr.bf16.mxu0 %v477_v25  ;;  %1445 = vmatprep.subr.bf16.mxu1 %v477_v25  ;;  %v691_v63 = vunpack.c.h.bf16 %v441_v62  ;;  %v690_v0 = vunpack.c.l.bf16 %v441_v62  ;;  %v663_v7 = vld [vmem:[#allocation3 + $0x18] sm:$0xff]  ;;  %v665_v13 = vld [vmem:[#allocation3 + $0x28] sm:$0xff]  ;;  %v664_v14 = vld [vmem:[#allocation3 + $0x20] sm:$0xff] }
  0x49   : > { %v667_v19 = vld [vmem:[#allocation3 + $0x38] sm:$0xff]  ;;  %v666_v20 = vld [vmem:[#allocation3 + $0x30] sm:$0xff]  ;;  %v668_v26 = vld [vmem:[#allocation3 + $0x40] sm:$0xff] }
  0x4a   : > { %698 = vadd.xlane.f32.xlu1 %v679_v36  ;;  %694 = vadd.xlane.f32.xlu0 %v677_v37  ;;  %v671_v31 = vld [vmem:[#allocation3 + $0x58] sm:$0xff]  ;;  %v670_v32 = vld [vmem:[#allocation3 + $0x50] sm:$0xff]  ;;  %v673_v37 = vld [vmem:[#allocation3 + $0x68] sm:$0xff] }
  0x4b   : > { %1384 = vmatpush3.bf16.msra.mxu0 %v477_v25  ;;  %1453 = vmatpush3.bf16.msra.mxu1 %v477_v25  ;;  %v669_v25 = vld [vmem:[#allocation3 + $0x48] sm:$0xff]  ;;  %v443_v51 = vld [vmem:[#allocation2] sm:$0xff] }
  0x4c   : > { %1385 = vmatprep.subr.bf16.mxu0 %v478_v33  ;;  %1446 = vmatprep.subr.bf16.mxu1 %v478_v33  ;;  %v451_v52 = vld [vmem:[#allocation2 + $0x40] sm:$0xff] }
  0x4e   : > { %702 = vadd.xlane.f32.xlu1 %v681_v42  ;;  %700 = vadd.xlane.f32.xlu0 %v680_v43  ;;  %v675_v43 = vld [vmem:[#allocation3 + $0x78] sm:$0xff] }
  0x4f   : > { %1386 = vmatpush3.bf16.msra.mxu0 %v478_v33  ;;  %1454 = vmatpush3.bf16.msra.mxu1 %v478_v33 }
  0x50   : > { %1387 = vmatprep.subr.bf16.mxu0 %v479_v38  ;;  %1447 = vmatprep.subr.bf16.mxu1 %v479_v38 }
  0x52   : > { %706 = vadd.xlane.f32.xlu1 %v683_v48  ;;  %704 = vadd.xlane.f32.xlu0 %v682_v49  ;;  %v445_v49 = vld [vmem:[#allocation2 + $0x10] sm:$0xff] }
  0x53   : > { %1388 = vmatpush3.bf16.msra.mxu0 %v479_v38  ;;  %1455 = vmatpush3.bf16.msra.mxu1 %v479_v38  ;;  %v672_v38 = vld [vmem:[#allocation3 + $0x60] sm:$0xff] }
  0x54   : > { %1389 = vmatprep.subr.bf16.mxu0 %v480_v44  ;;  %1448 = vmatprep.subr.bf16.mxu1 %v480_v44 }
  0x56   : > { %710 = vadd.xlane.f32.xlu1 %v685_v53  ;;  %708 = vadd.xlane.f32.xlu0 %v684_v54 }
  0x57   : > { %1390 = vmatpush3.bf16.msra.mxu0 %v480_v44  ;;  %1456 = vmatpush3.bf16.msra.mxu1 %v480_v44  ;;  %v674_v44 = vld [vmem:[#allocation3 + $0x70] sm:$0xff] }
  0x58   : > { %1391 = vmatprep.subr.bf16.mxu0 %v481_v50  ;;  %1449 = vmatprep.subr.bf16.mxu1 %v481_v50 }
  0x5a   : > { %714 = vadd.xlane.f32.xlu1 %v687_v57  ;;  %712 = vadd.xlane.f32.xlu0 %v686_v58 }
  0x5b   : > { %1392 = vmatpush3.bf16.msra.mxu0 %v481_v50  ;;  %1457 = vmatpush3.bf16.msra.mxu1 %v481_v50  ;;  %v453_v50 = vld [vmem:[#allocation2 + $0x50] sm:$0xff] }
  0x5c   : > { %1393 = vmatprep.subr.bf16.mxu0 %v482_v55  ;;  %1450 = vmatprep.subr.bf16.mxu1 %v482_v55 }
  0x5e   : > { %718 = vadd.xlane.f32.xlu1 %v689_v60  ;;  %716 = vadd.xlane.f32.xlu0 %v688_v61  ;;  %v452_v61 = vld [vmem:[#allocation2 + $0x48] sm:$0xff] }
  0x5f   : > { %1394 = vmatpush3.bf16.msra.mxu0 %v482_v55  ;;  %1458 = vmatpush3.bf16.msra.mxu1 %v482_v55  ;;  %v446_v55 = vld [vmem:[#allocation2 + $0x18] sm:$0xff] }
  0x62   : > { %1396 = vmatmul.mubr.bf16.vlgmr.msra.gmra.mrb[0].mxu0 %v1799_v30  ;;  %1404 = vmatmul.mubr.bf16.vlgmr.msra.gmra.mrb[0].mxu1 %v437_v56  ;;  %v454_v56 = vld [vmem:[#allocation2 + $0x58] sm:$0xff] }
  0x63   : > { %1399 = vmatprep.mubr.bf16.mxu0 %v431_v41  ;;  %1407 = vmatprep.mubr.bf16.mxu1 %v439_v59 }
  0x64   : > { %722 = vadd.xlane.f32.xlu1 %v691_v63  ;;  %720 = vadd.xlane.f32.xlu0 %v690_v0 }
  0x6a   : > { %1400 = vmatmul.mubr.bf16.gmra.mrb[4].mxu0 %v433_v47  ;;  %1408 = vmatmul.mubr.bf16.gmra.mrb[4].mxu1 %v441_v62  ;;  %v444_v62 = vld [vmem:[#allocation2 + $0x8] sm:$0xff] }
  0xd3   : > { %v697_v3 = vpop.xlane.xlu1 %696  ;;  %v693_v4 = vpop.xlane.xlu0 %692 }
  0xd4   : > { %v726_v5 = vadd.f32 %v697_v3, %v662_v1  ;;  %v724_v6 = vadd.f32 %v693_v4, %v660_v2 }
  0xd6   : > { %743 = vst.msk [vmem:[#allocation3 + $0x10] sm:$0xff] %vm740_vm1, %v726_v5  ;;  %741 = vst.msk [vmem:[#allocation3] sm:$0xff] %vm740_vm1, %v724_v6 }
  0xd7   : > { %v699_v9 = vpop.xlane.xlu1 %698  ;;  %v695_v10 = vpop.xlane.xlu0 %694 }
  0xd8   : > { %v727_v11 = vadd.f32 %v699_v9, %v663_v7  ;;  %v725_v12 = vadd.f32 %v695_v10, %v661_v8  ;;  %v449_v9 = vld [vmem:[#allocation2 + $0x30] sm:$0xff] }
  0xd9   : > { %v457_v10 = vld [vmem:[#allocation2 + $0x70] sm:$0xff] }
  0xda   : > { %744 = vst.msk [vmem:[#allocation3 + $0x18] sm:$0xff] %vm740_vm1, %v727_v11  ;;  %742 = vst.msk [vmem:[#allocation3 + $0x8] sm:$0xff] %vm740_vm1, %v725_v12  ;;  %v447_v11 = vld [vmem:[#allocation2 + $0x20] sm:$0xff] }
  0xdb   : > { %v703_v15 = vpop.xlane.xlu1 %702  ;;  %v701_v16 = vpop.xlane.xlu0 %700  ;;  %v455_v12 = vld [vmem:[#allocation2 + $0x60] sm:$0xff] }
  0xdc   : > { %v729_v17 = vadd.f32 %v703_v15, %v665_v13  ;;  %v728_v18 = vadd.f32 %v701_v16, %v664_v14  ;;  %v450_v15 = vld [vmem:[#allocation2 + $0x38] sm:$0xff] }
  0xdd   : > { %v458_v16 = vld [vmem:[#allocation2 + $0x78] sm:$0xff] }
  0xde   : > { %746 = vst.msk [vmem:[#allocation3 + $0x28] sm:$0xff] %vm740_vm1, %v729_v17  ;;  %745 = vst.msk [vmem:[#allocation3 + $0x20] sm:$0xff] %vm740_vm1, %v728_v18 }
  0xdf   : > { %v707_v21 = vpop.xlane.xlu1 %706  ;;  %v705_v22 = vpop.xlane.xlu0 %704 }
  0xe0   : > { %v731_v23 = vadd.f32 %v707_v21, %v667_v19  ;;  %v730_v24 = vadd.f32 %v705_v22, %v666_v20  ;;  %v456_v21 = vld [vmem:[#allocation2 + $0x68] sm:$0xff] }
  0xe1   : > { %v448_v22 = vld [vmem:[#allocation2 + $0x28] sm:$0xff] }
  0xe2   : > { %748 = vst.msk [vmem:[#allocation3 + $0x38] sm:$0xff] %vm740_vm1, %v731_v23  ;;  %747 = vst.msk [vmem:[#allocation3 + $0x30] sm:$0xff] %vm740_vm1, %v730_v24 }
  0xe3   : > { %v711_v27 = vpop.xlane.xlu1 %710  ;;  %v709_v28 = vpop.xlane.xlu0 %708 }
  0xe4   : > { %v733_v29 = vadd.f32 %v711_v27, %v669_v25  ;;  %v732_v30 = vadd.f32 %v709_v28, %v668_v26 }
  0xe6   : > { %750 = vst.msk [vmem:[#allocation3 + $0x48] sm:$0xff] %vm740_vm1, %v733_v29  ;;  %749 = vst.msk [vmem:[#allocation3 + $0x40] sm:$0xff] %vm740_vm1, %v732_v30 }
  0xe7   : > { %v715_v33 = vpop.xlane.xlu1 %714  ;;  %v713_v34 = vpop.xlane.xlu0 %712 }
  0xe8   : > { %v735_v35 = vadd.f32 %v715_v33, %v671_v31  ;;  %v734_v36 = vadd.f32 %v713_v34, %v670_v32  ;;  %v762_v33 = vld [vmem:[#allocation3 + $0x8] sm:$0xff] (!%p1278_p13)  ;;  %v761_v34 = vld [vmem:[#allocation3] sm:$0xff] (!%p1278_p13) }
  0xea   : > { %752 = vst.msk [vmem:[#allocation3 + $0x58] sm:$0xff] %vm740_vm1, %v735_v35  ;;  %751 = vst.msk [vmem:[#allocation3 + $0x50] sm:$0xff] %vm740_vm1, %v734_v36  ;;  %v1640_v36 = vmov (!%p1278_p13), 0  }
  0xeb   : > { %v719_v39 = vpop.xlane.xlu1 %718  ;;  %v717_v40 = vpop.xlane.xlu0 %716  ;;  %1550 = vset.pattern.permute.xlu1 (!%p1278_p13), %v1640_v36  ;;  %1549 = vset.pattern.permute.xlu0 (!%p1278_p13), %v1640_v36 }
  0xec   : > { %v737_v41 = vadd.f32 %v719_v39, %v673_v37  ;;  %v736_v42 = vadd.f32 %v717_v40, %v672_v38  ;;  %v778_v37 = vmax.f32 (!%p1278_p13), %v762_v33, 1.0  ;;  %v777_v38 = vmax.f32 (!%p1278_p13), %v761_v34, 1.0 }
  0xed   : > { %v770_v35 = vld [vmem:[#allocation3 + $0x48] sm:$0xff] (!%p1278_p13)  ;;  %v769_v40 = vld [vmem:[#allocation3 + $0x40] sm:$0xff] (!%p1278_p13) }
  0xee   : > { %754 = vst.msk [vmem:[#allocation3 + $0x68] sm:$0xff] %vm740_vm1, %v737_v41  ;;  %753 = vst.msk [vmem:[#allocation3 + $0x60] sm:$0xff] %vm740_vm1, %v736_v42  ;;  %v786_v39 = vmax.f32 (!%p1278_p13), %v770_v35, 1.0  ;;  %v785_v41 = vmax.f32 (!%p1278_p13), %v769_v40, 1.0  ;;  %1551 = vrcp.f32 (!%p1278_p13), %v778_v37 }
  0xef   : > { %1553 = vrcp.f32 (!%p1278_p13), %v777_v38  ;;  %v947_v38 = vld [vmem:[%s2007_s3 + $0x50] sm:$0xff] (!%p1278_p13) }
  0xf0   : > { %1555 = vrcp.f32 (!%p1278_p13), %v786_v39  ;;  %v948_v39 = vld [vmem:[%s2007_s3 + $0x58] sm:$0xff] (!%p1278_p13) }
  0xf1   : > { %v723_v45 = vpop.xlane.xlu1 %722  ;;  %v721_v46 = vpop.xlane.xlu0 %720  ;;  %v771_v42 = vld [vmem:[#allocation3 + $0x50] sm:$0xff] (!%p1278_p13)  ;;  %1557 = vrcp.f32 (!%p1278_p13), %v785_v41  ;;  %v768_v41 = vld [vmem:[#allocation3 + $0x38] sm:$0xff] (!%p1278_p13) }
  0xf2   : > { %v739_v47 = vadd.f32 %v723_v45, %v675_v43  ;;  %v738_v48 = vadd.f32 %v721_v46, %v674_v44  ;;  %v763_v43 = vld [vmem:[#allocation3 + $0x10] sm:$0xff] (!%p1278_p13)  ;;  %v772_v44 = vld [vmem:[#allocation3 + $0x58] sm:$0xff] (!%p1278_p13)  ;;  %v787_v45 = vmax.f32 (!%p1278_p13), %v771_v42, 1.0  ;;  %v965_v42 = vld [vmem:[%s2007_s3 + $0xe0] sm:$0xff] (!%p1278_p13) }
  0xf3   : > { %v764_v46 = vld [vmem:[#allocation3 + $0x18] sm:$0xff] (!%p1278_p13) }
  0xf4   : > { %756 = vst.msk [vmem:[#allocation3 + $0x78] sm:$0xff] %vm740_vm1, %v739_v47  ;;  %755 = vst.msk [vmem:[#allocation3 + $0x70] sm:$0xff] %vm740_vm1, %v738_v48  ;;  %v953_v47 = vld [vmem:[%s2007_s3 + $0x80] sm:$0xff] (!%p1278_p13)  ;;  %v954_v48 = vld [vmem:[%s2007_s3 + $0x88] sm:$0xff] (!%p1278_p13)  ;;  %1559 = vrcp.f32 (!%p1278_p13), %v787_v45 }
  0xfb   : > { %v776_v36 = vld [vmem:[#allocation3 + $0x78] sm:$0xff] (!%p1278_p13) }
  0xfc   : > { %v792_v45 = vmax.f32 (!%p1278_p13), %v776_v36, 1.0 }
 0x135   : > { %v1397_v53 = vpop.f32.mrb[0].mxu0  ;;  %v1405_v54 = vpop.f32.mrb[0].mxu1 }
 0x136   : > { %v630_v57 = vadd.f32 %v1397_v53, %v445_v49  ;;  %v638_v58 = vadd.f32 %v1405_v54, %v453_v50  ;;  %v565_v59 = vpop.f32.mrb[1].mxu0  ;;  %v597_v60 = vpop.f32.mrb[1].mxu1  ;;  %v779_v49 = vmax.f32 (!%p1278_p13), %v763_v43, 1.0  ;;  %v1411_v50 = vpack.c.bf16 (!%p1278_p13), %v954_v48, %v953_v47  ;;  %v955_v53 = vld [vmem:[%s2007_s3 + $0x90] sm:$0xff] (!%p1278_p13)  ;;  %v966_v43 = vld [vmem:[%s2007_s3 + $0xe8] sm:$0xff] (!%p1278_p13) }
 0x137   : > { %v628_v63 = vadd.f32 %v565_v59, %v443_v51  ;;  %v636_v0 = vadd.f32 %v597_v60, %v451_v52  ;;  %v1398_v1 = vpop.f32.mrb[2].mxu0  ;;  %v1406_v2 = vpop.f32.mrb[2].mxu1  ;;  %v937_v51 = vld [vmem:[%s2007_s3] sm:$0xff] (!%p1278_p13)  ;;  %v938_v52 = vld [vmem:[%s2007_s3 + $0x8] sm:$0xff] (!%p1278_p13)  ;;  %v784_v47 = vmax.f32 (!%p1278_p13), %v768_v41, 1.0  ;;  %v1435_v48 = vpack.c.bf16 (!%p1278_p13), %v966_v43, %v965_v42 }
 0x138   : > { %646 = vst [vmem:[#allocation2 + $0x10] sm:$0xff] %v630_v57  ;;  %654 = vst [vmem:[#allocation2 + $0x50] sm:$0xff] %v638_v58  ;;  %v631_v3 = vadd.f32 %v1398_v1, %v446_v55  ;;  %v639_v4 = vadd.f32 %v1406_v2, %v454_v56  ;;  %v600_v5 = vpop.f32.mrb[3].mxu1  ;;  %v568_v6 = vpop.f32.mrb[3].mxu0  ;;  %v1413_v54 = vpack.c.bf16 (!%p1278_p13), %v938_v52, %v937_v51  ;;  %v956_v55 = vld [vmem:[%s2007_s3 + $0x98] sm:$0xff] (!%p1278_p13)  ;;  %v939_v56 = vld [vmem:[%s2007_s3 + $0x10] sm:$0xff] (!%p1278_p13)  ;;  %1412 = vmatprep.subr.bf16.mxu0 (!%p1278_p13), %v1411_v50 }
 0x139   : > { %644 = vst [vmem:[#allocation2] sm:$0xff] %v628_v63  ;;  %652 = vst [vmem:[#allocation2 + $0x40] sm:$0xff] %v636_v0  ;;  %v637_v7 = vadd.f32 %v600_v5, %v452_v61  ;;  %v629_v8 = vadd.f32 %v568_v6, %v444_v62  ;;  %v940_v57 = vld [vmem:[%s2007_s3 + $0x18] sm:$0xff] (!%p1278_p13)  ;;  %1459 = vmatprep.subr.bf16.mxu1 (!%p1278_p13), %v1411_v50  ;;  %v1415_v58 = vpack.c.bf16 (!%p1278_p13), %v956_v55, %v955_v53  ;;  %v957_v59 = vld [vmem:[%s2007_s3 + $0xa0] sm:$0xff] (!%p1278_p13) }
 0x13a   : > { %647 = vst [vmem:[#allocation2 + $0x18] sm:$0xff] %v631_v3  ;;  %655 = vst [vmem:[#allocation2 + $0x58] sm:$0xff] %v639_v4  ;;  %v958_v60 = vld [vmem:[%s2007_s3 + $0xa8] sm:$0xff] (!%p1278_p13)  ;;  %v788_v61 = vmax.f32 (!%p1278_p13), %v772_v44, 1.0  ;;  %1414 = vmatpush3.bf16.msra.mxu0 (!%p1278_p13), %v1413_v54  ;;  %1467 = vmatpush3.bf16.msra.mxu1 (!%p1278_p13), %v1413_v54  ;;  %v1417_v62 = vpack.c.bf16 (!%p1278_p13), %v940_v57, %v939_v56  ;;  %1561 = vrcp.f32 (!%p1278_p13), %v779_v49  ;;  %v780_v63 = vmax.f32 (!%p1278_p13), %v764_v46, 1.0  ;;  %v773_v0 = vld [vmem:[#allocation3 + $0x60] sm:$0xff] (!%p1278_p13) }
 0x13b   : > { %653 = vst [vmem:[#allocation2 + $0x48] sm:$0xff] %v637_v7  ;;  %645 = vst [vmem:[#allocation2 + $0x8] sm:$0xff] %v629_v8  ;;  %1416 = vmatprep.subr.bf16.mxu0 (!%p1278_p13), %v1415_v58  ;;  %1460 = vmatprep.subr.bf16.mxu1 (!%p1278_p13), %v1415_v58  ;;  %v1419_v1 = vpack.c.bf16 (!%p1278_p13), %v958_v60, %v957_v59  ;;  %v941_v2 = vld [vmem:[%s2007_s3 + $0x20] sm:$0xff] (!%p1278_p13)  ;;  %v942_v3 = vld [vmem:[%s2007_s3 + $0x28] sm:$0xff] (!%p1278_p13)  ;;  %v1552_v7 = vpop.eup (!%p1278_p13), %1551  ;;  %v789_v8 = vmax.f32 (!%p1278_p13), %v773_v0, 1.0  ;;  %v1433_v46 = vpack.c.bf16 (!%p1278_p13), %v948_v39, %v947_v38 }
 0x13c   : > { %v765_v4 = vld [vmem:[#allocation3 + $0x20] sm:$0xff] (!%p1278_p13)  ;;  %v959_v5 = vld [vmem:[%s2007_s3 + $0xb0] sm:$0xff] (!%p1278_p13)  ;;  %v960_v6 = vld [vmem:[%s2007_s3 + $0xb8] sm:$0xff] (!%p1278_p13)  ;;  %1563 = vrcp.f32 (!%p1278_p13), %v788_v61  ;;  %832 = vperm.xlu1 (!%p1278_p13), %1550, %v1552_v7  }
 0x13d   : > { %v1401_v13 = vpop.f32.mrb[4].mxu0  ;;  %v1409_v14 = vpop.f32.mrb[4].mxu1  ;;  %760 = sbr.rel (%p1278_p13) target bundleno = 705 (0x2c1), region = 89  ;;  %1565 = vrcp.f32 (!%p1278_p13), %v780_v63  ;;  %v949_v49 = vld [vmem:[%s2007_s3 + $0x60] sm:$0xff] (!%p1278_p13)  ;;  %v950_v50 = vld [vmem:[%s2007_s3 + $0x68] sm:$0xff] (!%p1278_p13)  ;;  %v967_v52 = vld [vmem:[%s2007_s3 + $0xf0] sm:$0xff] (!%p1278_p13) }
 0x13e   : > { %v634_v17 = vadd.f32 %v1401_v13, %v449_v9  ;;  %v642_v18 = vadd.f32 %v1409_v14, %v457_v10  ;;  %v581_v19 = vpop.f32.mrb[5].mxu0  ;;  %v613_v20 = vpop.f32.mrb[5].mxu1  ;;  %1418 = vmatpush3.bf16.msra.mxu0 (!%p1278_p13), %v1417_v62  ;;  %1468 = vmatpush3.bf16.msra.mxu1 (!%p1278_p13), %v1417_v62  ;;  %v1421_v9 = vpack.c.bf16 (!%p1278_p13), %v942_v3, %v941_v2  ;;  %v943_v14 = vld [vmem:[%s2007_s3 + $0x30] sm:$0xff] (!%p1278_p13)  ;;  %1567 = vrcp.f32 (!%p1278_p13), %v789_v8  ;;  %v968_v53 = vld [vmem:[%s2007_s3 + $0xf8] sm:$0xff] (!%p1278_p13)  ;;  %v921_v8 = vld [vmem:[%s1762_s12] sm:$0xff] (!%p1278_p13) }
 0x13f   : > { %v632_v23 = vadd.f32 %v581_v19, %v447_v11  ;;  %v640_v24 = vadd.f32 %v613_v20, %v455_v12  ;;  %v1402_v25 = vpop.f32.mrb[6].mxu0  ;;  %v1410_v26 = vpop.f32.mrb[6].mxu1  ;;  %v781_v11 = vmax.f32 (!%p1278_p13), %v765_v4, 1.0  ;;  %v774_v12 = vld [vmem:[#allocation3 + $0x68] sm:$0xff] (!%p1278_p13)  ;;  %1420 = vmatprep.subr.bf16.mxu0 (!%p1278_p13), %v1419_v1  ;;  %v1423_v13 = vpack.c.bf16 (!%p1278_p13), %v960_v6, %v959_v5  ;;  %1461 = vmatprep.subr.bf16.mxu1 (!%p1278_p13), %v1419_v1  ;;  %v951_v57 = vld [vmem:[%s2007_s3 + $0x70] sm:$0xff] (!%p1278_p13)  ;;  %v952_v58 = vld [vmem:[%s2007_s3 + $0x78] sm:$0xff] (!%p1278_p13) }
 0x140   : > { %650 = vst [vmem:[#allocation2 + $0x30] sm:$0xff] %v634_v17  ;;  %658 = vst [vmem:[#allocation2 + $0x70] sm:$0xff] %v642_v18  ;;  %v635_v27 = vadd.f32 %v1402_v25, %v450_v15  ;;  %v643_v28 = vadd.f32 %v1410_v26, %v458_v16  ;;  %v616_v29 = vpop.f32.mrb[7].mxu1  ;;  %v584_v30 = vpop.f32.mrb[7].mxu0  ;;  %v944_v15 = vld [vmem:[%s2007_s3 + $0x38] sm:$0xff] (!%p1278_p13)  ;;  %v766_v17 = vld [vmem:[#allocation3 + $0x28] sm:$0xff] (!%p1278_p13)  ;;  %v1437_v55 = vpack.c.bf16 (!%p1278_p13), %v950_v50, %v949_v49 }
 0x141   : > { %648 = vst [vmem:[#allocation2 + $0x20] sm:$0xff] %v632_v23  ;;  %656 = vst [vmem:[#allocation2 + $0x60] sm:$0xff] %v640_v24  ;;  %v641_v31 = vadd.f32 %v616_v29, %v456_v21  ;;  %v633_v32 = vadd.f32 %v584_v30, %v448_v22  ;;  %v1554_v10 = vpop.eup (!%p1278_p13), %1553  ;;  %v961_v18 = vld [vmem:[%s2007_s3 + $0xc0] sm:$0xff] (!%p1278_p13)  ;;  %v962_v19 = vld [vmem:[%s2007_s3 + $0xc8] sm:$0xff] (!%p1278_p13)  ;;  %v790_v21 = vmax.f32 (!%p1278_p13), %v774_v12, 1.0  ;;  %v1425_v22 = vpack.c.bf16 (!%p1278_p13), %v944_v15, %v943_v14 }
 0x142   : > { %651 = vst [vmem:[#allocation2 + $0x38] sm:$0xff] %v635_v27  ;;  %659 = vst [vmem:[#allocation2 + $0x78] sm:$0xff] %v643_v28  ;;  %v1556_v16 = vpop.eup (!%p1278_p13), %1555  ;;  %827 = vperm.xlu0 (!%p1278_p13), %1549, %v1554_v10   ;;  %1422 = vmatpush3.bf16.msra.mxu0 (!%p1278_p13), %v1421_v9  ;;  %1569 = vrcp.f32 (!%p1278_p13), %v781_v11  ;;  %v782_v23 = vmax.f32 (!%p1278_p13), %v766_v17, 1.0  ;;  %v775_v24 = vld [vmem:[#allocation3 + $0x70] sm:$0xff] (!%p1278_p13)  ;;  %v1427_v25 = vpack.c.bf16 (!%p1278_p13), %v962_v19, %v961_v18  ;;  %v945_v26 = vld [vmem:[%s2007_s3 + $0x40] sm:$0xff] (!%p1278_p13) }
 0x143   : > { %657 = vst [vmem:[#allocation2 + $0x68] sm:$0xff] %v641_v31  ;;  %649 = vst [vmem:[#allocation2 + $0x28] sm:$0xff] %v633_v32  ;;  %v1558_v20 = vpop.eup (!%p1278_p13), %1557  ;;  %1469 = vmatpush3.bf16.msra.mxu1 (!%p1278_p13), %v1421_v9  ;;  %872 = vperm.xlu1 (!%p1278_p13), %1550, %v1556_v16   ;;  %v946_v27 = vld [vmem:[%s2007_s3 + $0x48] sm:$0xff] (!%p1278_p13)  ;;  %v767_v29 = vld [vmem:[#allocation3 + $0x30] sm:$0xff] (!%p1278_p13)  ;;  %1571 = vrcp.f32 (!%p1278_p13), %v790_v21  ;;  %v791_v33 = vmax.f32 (!%p1278_p13), %v775_v24, 1.0  ;;  %v1439_v56 = vpack.c.bf16 (!%p1278_p13), %v968_v53, %v967_v52 }
 0x144   : > { %1424 = vmatprep.subr.bf16.mxu0 %v1423_v13  ;;  %v1560_v28 = vpop.eup %1559  ;;  %1462 = vmatprep.subr.bf16.mxu1 %v1423_v13  ;;  %v963_v30 = vld [vmem:[%s2007_s3 + $0xd0] sm:$0xff]  ;;  %v964_v31 = vld [vmem:[%s2007_s3 + $0xd8] sm:$0xff]  ;;  %v1429_v34 = vpack.c.bf16 %v946_v27, %v945_v26  ;;  %1573 = vrcp.f32 %v782_v23  ;;  %v783_v35 = vmax.f32 %v767_v29, 1.0  ;;  %v1441_v61 = vpack.c.bf16 %v952_v58, %v951_v57  ;;  %v810_v2 = vld [vmem:[#allocation2 + $0x8] sm:$0xff] }
 0x145   : > { %v1562_v32 = vpop.eup %1561  ;;  %v1431_v37 = vpack.c.bf16 %v964_v31, %v963_v30  ;;  %1575 = vrcp.f32 %v791_v33  ;;  %v809_v3 = vld [vmem:[#allocation2] sm:$0xff]  ;;  %v818_v11 = vld [vmem:[#allocation2 + $0x48] sm:$0xff]  ;;  %v811_v16 = vld [vmem:[#allocation2 + $0x10] sm:$0xff] }
 0x146   : > { %867 = vperm.xlu0 %1549, %v1558_v20   ;;  %1426 = vmatpush3.bf16.msra.mxu0 %v1425_v22  ;;  %v1564_v40 = vpop.eup %1563  ;;  %1577 = vrcp.f32 %v783_v35  ;;  %v817_v9 = vld [vmem:[#allocation2 + $0x40] sm:$0xff]  ;;  %v922_v15 = vld [vmem:[%s1762_s12 + $0x8] sm:$0xff]  ;;  %v819_v19 = vld [vmem:[#allocation2 + $0x50] sm:$0xff] }
 0x147   : > { %1470 = vmatpush3.bf16.msra.mxu1 %v1425_v22  ;;  %877 = vperm.xlu1 %1550, %v1560_v28   ;;  %v1566_v44 = vpop.eup %1565  ;;  %1579 = vrcp.f32 %v792_v45  ;;  %v929_v14 = vld [vmem:[%s1762_s12 + $0x40] sm:$0xff]  ;;  %v930_v22 = vld [vmem:[%s1762_s12 + $0x48] sm:$0xff]  ;;  %v923_v23 = vld [vmem:[%s1762_s12 + $0x10] sm:$0xff] }
 0x148   : > { %1428 = vmatprep.subr.bf16.mxu0 %v1427_v25  ;;  %1463 = vmatprep.subr.bf16.mxu1 %v1427_v25  ;;  %v1568_v51 = vpop.eup %1567  ;;  %1581 = vrcp.f32 %v784_v47  ;;  %v812_v24 = vld [vmem:[#allocation2 + $0x18] sm:$0xff]  ;;  %v931_v30 = vld [vmem:[%s1762_s12 + $0x50] sm:$0xff]  ;;  %v821_v35 = vld [vmem:[#allocation2 + $0x60] sm:$0xff] }
 0x149   : > { %v820_v27 = vld [vmem:[#allocation2 + $0x58] sm:$0xff]  ;;  %v925_v39 = vld [vmem:[%s1762_s12 + $0x20] sm:$0xff]  ;;  %v926_v47 = vld [vmem:[%s1762_s12 + $0x28] sm:$0xff] }
 0x14a   : > { %837 = vperm.xlu0 %1549, %v1562_v32   ;;  %1430 = vmatpush3.bf16.msra.mxu0 %v1429_v34  ;;  %v924_v31 = vld [vmem:[%s1762_s12 + $0x18] sm:$0xff]  ;;  %v813_v32 = vld [vmem:[#allocation2 + $0x20] sm:$0xff]  ;;  %v822_v43 = vld [vmem:[#allocation2 + $0x68] sm:$0xff] }
 0x14b   : > { %1471 = vmatpush3.bf16.msra.mxu1 %v1429_v34  ;;  %882 = vperm.xlu1 %1550, %v1564_v40   ;;  %v932_v38 = vld [vmem:[%s1762_s12 + $0x58] sm:$0xff]  ;;  %v814_v40 = vld [vmem:[#allocation2 + $0x28] sm:$0xff] }
 0x14c   : > { %1432 = vmatprep.subr.bf16.mxu0 %v1431_v37  ;;  %1464 = vmatprep.subr.bf16.mxu1 %v1431_v37  ;;  %v1570_v54 = vpop.eup %1569  ;;  %v824_v58 = vld [vmem:[#allocation2 + $0x78] sm:$0xff] }
 0x14d   : > { %v1572_v59 = vpop.eup %1571 }
 0x14e   : > { %842 = vperm.xlu0 %1549, %v1566_v44   ;;  %1434 = vmatpush3.bf16.msra.mxu0 %v1433_v46  ;;  %v1574_v60 = vpop.eup %1573 }
 0x14f   : > { %1472 = vmatpush3.bf16.msra.mxu1 %v1433_v46  ;;  %887 = vperm.xlu1 %1550, %v1568_v51   ;;  %v1576_v62 = vpop.eup %1575  ;;  %v933_v46 = vld [vmem:[%s1762_s12 + $0x60] sm:$0xff]  ;;  %v823_v51 = vld [vmem:[#allocation2 + $0x70] sm:$0xff] }
 0x150   : > { %1436 = vmatprep.subr.bf16.mxu0 %v1435_v48  ;;  %1465 = vmatprep.subr.bf16.mxu1 %v1435_v48  ;;  %v1578_v63 = vpop.eup %1577  ;;  %v815_v48 = vld [vmem:[#allocation2 + $0x30] sm:$0xff] }
 0x151   : > { %v1580_v0 = vpop.eup %1579 }
 0x152   : > { %847 = vperm.xlu0 %1549, %v1570_v54   ;;  %1438 = vmatpush3.bf16.msra.mxu0 %v1437_v55  ;;  %v1582_v1 = vpop.eup %1581  ;;  %v934_v54 = vld [vmem:[%s1762_s12 + $0x68] sm:$0xff] }
 0x153   : > { %1473 = vmatpush3.bf16.msra.mxu1 %v1437_v55  ;;  %892 = vperm.xlu1 %1550, %v1572_v59   ;;  %v927_v55 = vld [vmem:[%s1762_s12 + $0x30] sm:$0xff] }
 0x154   : > { %1440 = vmatprep.subr.bf16.mxu0 %v1439_v56  ;;  %1466 = vmatprep.subr.bf16.mxu1 %v1439_v56  ;;  %v816_v56 = vld [vmem:[#allocation2 + $0x38] sm:$0xff] }
 0x156   : > { %852 = vperm.xlu0 %1549, %v1574_v60   ;;  %1442 = vmatpush3.bf16.msra.mxu0 %v1441_v61 }
 0x157   : > { %1474 = vmatpush3.bf16.msra.mxu1 %v1441_v61  ;;  %897 = vperm.xlu1 %1550, %v1576_v62   ;;  %v935_v62 = vld [vmem:[%s1762_s12 + $0x70] sm:$0xff] }
 0x15a   : > { %857 = vperm.xlu0 %1549, %v1578_v63   ;;  %v928_v63 = vld [vmem:[%s1762_s12 + $0x38] sm:$0xff] }
 0x15b   : > { %902 = vperm.xlu1 %1550, %v1580_v0  }
 0x15e   : > { %862 = vperm.xlu0 %1549, %v1582_v1   ;;  %v936_v1 = vld [vmem:[%s1762_s12 + $0x78] sm:$0xff] }
 0x1bb   : > { %v833_v4 = vpop.permute.xlu1 %832 }
 0x1bc   : > { %v906_v6 = vmul.f32 %v833_v4, %v810_v2 }
 0x1c1   : > { %v828_v5 = vpop.permute.xlu0 %827 }
 0x1c2   : > { %v905_v7 = vmul.f32 %v828_v5, %v809_v3  ;;  %v873_v10 = vpop.permute.xlu1 %872  ;;  %v1949_v3 = vld [vmem:[%s2008_s4] ss:$0 sm:$0xff] }
 0x1c3   : > { %v914_v17 = vmul.f32 %v873_v10, %v818_v11 }
 0x1c4   : > { %1040 = vmatprep.mubr.f32.mxu0 %v905_v7 }
 0x1c5   : > { %v868_v12 = vpop.permute.xlu0 %867  ;;  %1041 = vmatmul.mubr.f32.vlgmr.msra.gmra.mrb[0].mxu0 %v921_v8 }
 0x1c6   : > { %1045 = vmatprep.mubr.f32.mxu0 %v906_v6  ;;  %v913_v13 = vmul.f32 %v868_v12, %v817_v9  ;;  %v878_v18 = vpop.permute.xlu1 %877 }
 0x1c7   : > { %v915_v25 = vmul.f32 %v878_v18, %v819_v19 }
 0x1c8   : > { %1080 = vmatprep.mubr.f32.mxu1 %v913_v13 }
 0x1c9   : > { %1081 = vmatmul.mubr.f32.vlgmr.msra.gmra.mrb[0].mxu1 %v929_v14  ;;  %v838_v20 = vpop.permute.xlu0 %837  ;;  %1046 = vmatmul.mubr.f32.gmra.mrb[2].mxu0 %v922_v15 }
 0x1ca   : > { %v907_v21 = vmul.f32 %v838_v20, %v811_v16  ;;  %1085 = vmatprep.mubr.f32.mxu1 %v914_v17  ;;  %v883_v26 = vpop.permute.xlu1 %882 }
 0x1cb   : > { %v916_v33 = vmul.f32 %v883_v26, %v820_v27 }
 0x1cc   : > { %1050 = vmatprep.mubr.f32.mxu0 %v907_v21 }
 0x1cd   : > { %1086 = vmatmul.mubr.f32.gmra.mrb[2].mxu1 %v930_v22  ;;  %v843_v28 = vpop.permute.xlu0 %842  ;;  %1051 = vmatmul.mubr.f32.gmra.mrb[4].mxu0 %v923_v23 }
 0x1ce   : > { %v908_v29 = vmul.f32 %v843_v28, %v812_v24  ;;  %1090 = vmatprep.mubr.f32.mxu1 %v915_v25  ;;  %v888_v34 = vpop.permute.xlu1 %887 }
 0x1cf   : > { %v917_v41 = vmul.f32 %v888_v34, %v821_v35 }
 0x1d0   : > { %1055 = vmatprep.mubr.f32.mxu0 %v908_v29 }
 0x1d1   : > { %1091 = vmatmul.mubr.f32.gmra.mrb[4].mxu1 %v931_v30  ;;  %v848_v36 = vpop.permute.xlu0 %847  ;;  %1056 = vmatmul.mubr.f32.gmra.mrb[6].mxu0 %v924_v31 }
 0x1d2   : > { %v909_v37 = vmul.f32 %v848_v36, %v813_v32  ;;  %1095 = vmatprep.mubr.f32.mxu1 %v916_v33  ;;  %v893_v42 = vpop.permute.xlu1 %892 }
 0x1d3   : > { %v918_v49 = vmul.f32 %v893_v42, %v822_v43 }
 0x1d4   : > { %1060 = vmatprep.mubr.f32.mxu0 %v909_v37 }
 0x1d5   : > { %1096 = vmatmul.mubr.f32.gmra.mrb[6].mxu1 %v932_v38  ;;  %v853_v44 = vpop.permute.xlu0 %852  ;;  %1061 = vmatmul.mubr.f32.gmra.mrb[8].mxu0 %v925_v39 }
 0x1d6   : > { %v910_v45 = vmul.f32 %v853_v44, %v814_v40  ;;  %1100 = vmatprep.mubr.f32.mxu1 %v917_v41  ;;  %v898_v50 = vpop.permute.xlu1 %897 }
 0x1d7   : > { %v919_v57 = vmul.f32 %v898_v50, %v823_v51 }
 0x1d8   : > { %1065 = vmatprep.mubr.f32.mxu0 %v910_v45 }
 0x1d9   : > { %1101 = vmatmul.mubr.f32.gmra.mrb[8].mxu1 %v933_v46  ;;  %v858_v52 = vpop.permute.xlu0 %857  ;;  %1066 = vmatmul.mubr.f32.gmra.mrb[10].mxu0 %v926_v47 }
 0x1da   : > { %v911_v53 = vmul.f32 %v858_v52, %v815_v48  ;;  %1105 = vmatprep.mubr.f32.mxu1 %v918_v49  ;;  %v903_v59 = vpop.permute.xlu1 %902 }
 0x1db   : > { %v920_v0 = vmul.f32 %v903_v59, %v824_v58 }
 0x1dc   : > { %1070 = vmatprep.mubr.f32.mxu0 %v911_v53 }
 0x1dd   : > { %1106 = vmatmul.mubr.f32.gmra.mrb[10].mxu1 %v934_v54  ;;  %v863_v60 = vpop.permute.xlu0 %862  ;;  %1071 = vmatmul.mubr.f32.gmra.mrb[12].mxu0 %v927_v55 }
 0x1de   : > { %v912_v61 = vmul.f32 %v863_v60, %v816_v56  ;;  %1110 = vmatprep.mubr.f32.mxu1 %v919_v57 }
 0x1e0   : > { %1075 = vmatprep.mubr.f32.mxu0 %v912_v61 }
 0x1e1   : > { %1111 = vmatmul.mubr.f32.gmra.mrb[12].mxu1 %v935_v62  ;;  %1076 = vmatmul.mubr.f32.gmra.mrb[14].mxu0 %v928_v63 }
 0x1e2   : > { %1115 = vmatprep.mubr.f32.mxu1 %v920_v0 }
 0x1e5   : > { %1116 = vmatmul.mubr.f32.gmra.mrb[14].mxu1 %v936_v1 }
 0x298   : > { %v1331_v2 = vpop.f32.mrb[0].mxu0 }
 0x299   : > { %v1332_v4 = vpop.f32.mrb[1].mxu0 }
 0x29a   : > { %v1333_v5 = vadd.f32 %v1332_v4, %v1331_v2 }
 0x29c   : > { %v1043_v6 = vadd.f32 %v1333_v5, %v1949_v3  ;;  %v1355_v7 = vpop.f32.mrb[0].mxu1  ;;  %v1334_v8 = vpop.f32.mrb[2].mxu0 }
 0x29d   : > { %v1356_v9 = vpop.f32.mrb[1].mxu1  ;;  %v1335_v10 = vpop.f32.mrb[3].mxu0 }
 0x29e   : > { %v1121_v11 = vmax.f32 %v1043_v6, 0.0  ;;  %v1357_v12 = vadd.f32 %v1356_v9, %v1355_v7  ;;  %v1336_v13 = vadd.f32 %v1335_v10, %v1334_v8 }
 0x2a0   : > { %1137 = vst [vmem:[%s1767_s14] sm:$0xff] %v1121_v11  ;;  %v1083_v14 = vadd.f32 %v1357_v12, %v1949_v3  ;;  %v1048_v15 = vadd.f32 %v1336_v13, %v1949_v3  ;;  %v1358_v16 = vpop.f32.mrb[2].mxu1  ;;  %v1337_v17 = vpop.f32.mrb[4].mxu0 }
 0x2a1   : > { %v1359_v18 = vpop.f32.mrb[3].mxu1  ;;  %v1338_v19 = vpop.f32.mrb[5].mxu0 }
 0x2a2   : > { %v1129_v20 = vmax.f32 %v1083_v14, 0.0  ;;  %v1122_v21 = vmax.f32 %v1048_v15, 0.0  ;;  %v1360_v22 = vadd.f32 %v1359_v18, %v1358_v16  ;;  %v1339_v23 = vadd.f32 %v1338_v19, %v1337_v17 }
 0x2a4   : > { %1145 = vst [vmem:[%s1767_s14 + $0x40] sm:$0xff] %v1129_v20  ;;  %1138 = vst [vmem:[%s1767_s14 + $0x8] sm:$0xff] %v1122_v21  ;;  %v1088_v24 = vadd.f32 %v1360_v22, %v1949_v3  ;;  %v1053_v25 = vadd.f32 %v1339_v23, %v1949_v3  ;;  %v1361_v26 = vpop.f32.mrb[4].mxu1  ;;  %v1340_v27 = vpop.f32.mrb[6].mxu0 }
 0x2a5   : > { %v1362_v28 = vpop.f32.mrb[5].mxu1  ;;  %v1341_v29 = vpop.f32.mrb[7].mxu0 }
 0x2a6   : > { %v1130_v30 = vmax.f32 %v1088_v24, 0.0  ;;  %v1123_v31 = vmax.f32 %v1053_v25, 0.0  ;;  %v1363_v32 = vadd.f32 %v1362_v28, %v1361_v26  ;;  %v1342_v33 = vadd.f32 %v1341_v29, %v1340_v27 }
 0x2a8   : > { %1146 = vst [vmem:[%s1767_s14 + $0x48] sm:$0xff] %v1130_v30  ;;  %1139 = vst [vmem:[%s1767_s14 + $0x10] sm:$0xff] %v1123_v31  ;;  %v1093_v34 = vadd.f32 %v1363_v32, %v1949_v3  ;;  %v1058_v35 = vadd.f32 %v1342_v33, %v1949_v3  ;;  %v1364_v36 = vpop.f32.mrb[6].mxu1  ;;  %v1343_v37 = vpop.f32.mrb[8].mxu0 }
 0x2a9   : > { %v1365_v38 = vpop.f32.mrb[7].mxu1  ;;  %v1344_v39 = vpop.f32.mrb[9].mxu0 }
 0x2aa   : > { %v1131_v40 = vmax.f32 %v1093_v34, 0.0  ;;  %v1124_v41 = vmax.f32 %v1058_v35, 0.0  ;;  %v1366_v42 = vadd.f32 %v1365_v38, %v1364_v36  ;;  %v1345_v43 = vadd.f32 %v1344_v39, %v1343_v37 }
 0x2ac   : > { %1147 = vst [vmem:[%s1767_s14 + $0x50] sm:$0xff] %v1131_v40  ;;  %1140 = vst [vmem:[%s1767_s14 + $0x18] sm:$0xff] %v1124_v41  ;;  %v1098_v44 = vadd.f32 %v1366_v42, %v1949_v3  ;;  %v1063_v45 = vadd.f32 %v1345_v43, %v1949_v3  ;;  %v1367_v46 = vpop.f32.mrb[8].mxu1  ;;  %v1346_v47 = vpop.f32.mrb[10].mxu0 }
 0x2ad   : > { %v1368_v48 = vpop.f32.mrb[9].mxu1  ;;  %v1347_v49 = vpop.f32.mrb[11].mxu0 }
 0x2ae   : > { %v1132_v50 = vmax.f32 %v1098_v44, 0.0  ;;  %v1125_v51 = vmax.f32 %v1063_v45, 0.0  ;;  %v1369_v52 = vadd.f32 %v1368_v48, %v1367_v46  ;;  %v1348_v53 = vadd.f32 %v1347_v49, %v1346_v47 }
 0x2b0   : > { %1148 = vst [vmem:[%s1767_s14 + $0x58] sm:$0xff] %v1132_v50  ;;  %1141 = vst [vmem:[%s1767_s14 + $0x20] sm:$0xff] %v1125_v51  ;;  %v1103_v54 = vadd.f32 %v1369_v52, %v1949_v3  ;;  %v1068_v55 = vadd.f32 %v1348_v53, %v1949_v3  ;;  %v1370_v56 = vpop.f32.mrb[10].mxu1  ;;  %v1349_v57 = vpop.f32.mrb[12].mxu0 }
 0x2b1   : > { %v1371_v58 = vpop.f32.mrb[11].mxu1  ;;  %v1350_v59 = vpop.f32.mrb[13].mxu0 }
 0x2b2   : > { %v1133_v60 = vmax.f32 %v1103_v54, 0.0  ;;  %v1126_v61 = vmax.f32 %v1068_v55, 0.0  ;;  %v1372_v62 = vadd.f32 %v1371_v58, %v1370_v56  ;;  %v1351_v63 = vadd.f32 %v1350_v59, %v1349_v57 }
 0x2b4   : > { %1149 = vst [vmem:[%s1767_s14 + $0x60] sm:$0xff] %v1133_v60  ;;  %1142 = vst [vmem:[%s1767_s14 + $0x28] sm:$0xff] %v1126_v61  ;;  %v1108_v0 = vadd.f32 %v1372_v62, %v1949_v3  ;;  %v1073_v1 = vadd.f32 %v1351_v63, %v1949_v3  ;;  %v1373_v2 = vpop.f32.mrb[12].mxu1  ;;  %v1352_v4 = vpop.f32.mrb[14].mxu0 }
 0x2b5   : > { %v1374_v5 = vpop.f32.mrb[13].mxu1  ;;  %v1353_v6 = vpop.f32.mrb[15].mxu0 }
 0x2b6   : > { %v1134_v7 = vmax.f32 %v1108_v0, 0.0  ;;  %v1127_v8 = vmax.f32 %v1073_v1, 0.0  ;;  %v1375_v9 = vadd.f32 %v1374_v5, %v1373_v2  ;;  %v1354_v10 = vadd.f32 %v1353_v6, %v1352_v4 }
 0x2b8   : > { %1150 = vst [vmem:[%s1767_s14 + $0x68] sm:$0xff] %v1134_v7  ;;  %1143 = vst [vmem:[%s1767_s14 + $0x30] sm:$0xff] %v1127_v8  ;;  %v1113_v11 = vadd.f32 %v1375_v9, %v1949_v3  ;;  %v1078_v12 = vadd.f32 %v1354_v10, %v1949_v3  ;;  %v1376_v13 = vpop.f32.mrb[14].mxu1 }
 0x2b9   : > { %v1377_v14 = vpop.f32.mrb[15].mxu1 }
 0x2ba   : > { %v1135_v15 = vmax.f32 %v1113_v11, 0.0  ;;  %v1128_v16 = vmax.f32 %v1078_v12, 0.0  ;;  %v1378_v17 = vadd.f32 %v1377_v14, %v1376_v13 }
 0x2bc   : > { %1151 = vst [vmem:[%s1767_s14 + $0x70] sm:$0xff] %v1135_v15  ;;  %1144 = vst [vmem:[%s1767_s14 + $0x38] sm:$0xff] %v1128_v16  ;;  %v1118_v18 = vadd.f32 %v1378_v17, %v1949_v3 }
 0x2be   : > { %v1136_v19 = vmax.f32 %v1118_v18, 0.0 }
 0x2c0   : > { %1152 = vst [vmem:[%s1767_s14 + $0x78] sm:$0xff] %v1136_v19 }
 0x2c1 PF: > { %s15_s24 = sadd.s32 1, %s1637_s24   ;;  %s2010_s18 = smov %s1617_s19 }
 0x2c2   : > { %p12_p0 = scmp.ge.s32.totalorder %s15_s24, 6   ;;  %s2011_s19 = smov %s1722_s6 }
 0x2c3   : > { %s2012_s20 = smov %s1629_s22  ;;  %s2013_s21 = smov %s1633_s23 }
 0x2c4   : > { %s2014_s22 = smov %s2017_s25  ;;  %s2015_s23 = smov %s2021_s26 }
 0x2c5   :  { %14 = sbr.rel (!%p12_p0) target bundleno = 4 (0x4), region = 130 }

</bundles_post_ra>
